<compile_context>
chip_gen: v6e
topology: v6e:2x2x1
jax: 0.10.0
libtpu: 0.0.40
codegen_flags: <defaults>
</compile_context>

<pallas_src>
import functools

import jax
import jax.numpy as jnp
from jax.experimental import pallas as pl
from jax.experimental.pallas import tpu as pltpu

EPS = 1e-6
_TARGET_BLOCK_BYTES = 4 << 20   # ~4 MiB of padded VMEM per block
_VMEM_LIMIT_BYTES = 40 << 20    # 2 x (in + out) blocks ~16 MiB -> lots of headroom


def _ln2d_kernel(x_ref, wb_ref, o_ref, *, eps):
    # x_ref: (Nb, C, TILE) -- channels on sublanes, flattened pixels on lanes.
    x = x_ref[...].astype(jnp.float32)
    mu = jnp.mean(x, axis=1, keepdims=True)            # (Nb, 1, TILE) sublane reduce
    d = x - mu
    var = jnp.mean(d * d, axis=1, keepdims=True)       # (Nb, 1, TILE)
    y = d * jax.lax.rsqrt(var + eps)                   # (Nb, C, TILE)
    w = wb_ref[:, 0:1][None]                           # (1, C, 1)
    b = wb_ref[:, 1:2][None]                           # (1, C, 1)
    o_ref[...] = (y * w + b).astype(o_ref.dtype)


def _round_up(v, m):
    return -(-v // m) * m


def _choose_blocking(N, C, HW_pad, itemsize):
    """Pick (Nb, tile) so one block is ~_TARGET_BLOCK_BYTES of padded VMEM."""
    sub = max(8, 32 // itemsize)             # sublane packing: f32->8, bf16->16
    c_pad = _round_up(C, sub)

    # Largest spatial tile (multiple of 128, divides HW_pad) under the budget.
    max_tile_elems = max(128, _TARGET_BLOCK_BYTES // (c_pad * itemsize))
    tile = 128
    d = 128
    while d <= HW_pad:
        if HW_pad % d == 0 and d <= max_tile_elems:
            tile = d
        d += 128

    # If the whole spatial extent fits in one block, fold batches too.
    nb = 1
    if tile == HW_pad:
        max_nb = max(1, _TARGET_BLOCK_BYTES // (c_pad * HW_pad * itemsize))
        for cand in range(1, N + 1):
            if N % cand == 0 and cand <= max_nb:
                nb = cand

    # v7x megacore: avoid a 1-step grid when we can split work evenly.
    n_steps = (N // nb) * (HW_pad // tile)
    if n_steps < 2:
        if nb >= 2:
            for cand in range(nb - 1, 0, -1):
                if N % cand == 0 and N // cand >= 2:
                    nb = cand
                    break
        elif HW_pad % 256 == 0:
            tile = HW_pad // 2

    return nb, tile


def layernorm2d_forward(x, weight, bias, eps=EPS):
    """x: (N, C, H, W); weight, bias: (C,).  Matches LayerNorm2d.forward."""
    N, C, H, W = x.shape
    HW = H * W
    itemsize = jnp.dtype(x.dtype).itemsize

    # Lane-dense spatial axis: pad HW up to a multiple of 128 so every store
    # is a full-width vst.  Padded columns are normalized garbage and sliced
    # off below (no NaNs: var=0 -> rsqrt(eps)).
    HW_pad = _round_up(HW, 128)
    x2 = x.reshape(N, C, HW)
    if HW_pad != HW:
        x2 = jnp.pad(x2, ((0, 0), (0, 0), (0, HW_pad - HW)))

    nb, tile = _choose_blocking(N, C, HW_pad, itemsize)
    grid = (N // nb, HW_pad // tile)

    wb = jnp.stack([weight, bias], axis=1).astype(jnp.float32)  # (C, 2)

    cost = pl.CostEstimate(
        flops=8 * N * C * HW_pad,
        transcendentals=N * HW_pad,
        bytes_accessed=2 * N * C * HW_pad * itemsize + 2 * C * 4,
    )

    out = pl.pallas_call(
        functools.partial(_ln2d_kernel, eps=eps),
        out_shape=jax.ShapeDtypeStruct((N, C, HW_pad), x.dtype),
        grid_spec=pltpu.PrefetchScalarGridSpec(
            num_scalar_prefetch=0,
            grid=grid,
            in_specs=[
                pl.BlockSpec((nb, C, tile), lambda n, t: (n, 0, t)),
                pl.BlockSpec((C, 2), lambda n, t: (0, 0)),
            ],
            out_specs=pl.BlockSpec((nb, C, tile), lambda n, t: (n, 0, t)),
        ),
        compiler_params=pltpu.CompilerParams(
            dimension_semantics=("parallel", "parallel"),
            vmem_limit_bytes=_VMEM_LIMIT_BYTES,
        ),
        cost_estimate=cost,
    )(x2, wb)

    if HW_pad != HW:
        out = out[:, :, :HW]
    return out.reshape(N, C, H, W)


def layernorm2d_reference(x, weight, bias, eps=EPS):
    """Pure-JAX reference mirroring the PyTorch LayerNormFunction.forward."""
    mu = x.mean(axis=1, keepdims=True)
    var = ((x - mu) ** 2).mean(axis=1, keepdims=True)
    y = (x - mu) / jnp.sqrt(var + eps)
    return weight[None, :, None, None] * y + bias[None, :, None, None]


if __name__ == "__main__":
    key = jax.random.PRNGKey(0)

    def check(n, c, h, w, k, tol=1e-4):
        kx, kw, kb = jax.random.split(k, 3)
        x = jax.random.normal(kx, (n, c, h, w), jnp.float32)
        weight = 1.0 + 0.2 * jax.random.normal(kw, (c,), jnp.float32)
        bias = 0.1 * jax.random.normal(kb, (c,), jnp.float32)
        out = jax.block_until_ready(layernorm2d_forward(x, weight, bias))
        ref = jax.block_until_ready(layernorm2d_reference(x, weight, bias))
        assert out.shape == x.shape
        err = float(jnp.max(jnp.abs(out - ref)))
        if not err < tol:
            raise AssertionError(
                f"mismatch vs reference at shape {(n, c, h, w)}: "
                f"max abs err = {err}")

    k1, k2, k3 = jax.random.split(key, 3)
    # Small shape consistent with the module (batch=2, channels=4, 16x16).
    check(2, 4, 16, 16, k1)
    # HW not a multiple of 128 -> exercises the pad/slice path (56*56 = 3136).
    check(1, 8, 56, 56, k2)
    # Larger shape exercising batch-folding / block-splitting logic.
    check(2, 16, 64, 64, k3)
    print("KERNEL_OK")
</pallas_src>

<mosaic_0001>
module attributes {stable_mosaic.version = 11 : i64} {
  func.func @_ln2d_kernel(%arg0: i32, %arg1: i32, %arg2: memref<1x4x256xf32, #tpu.memory_space<vmem>>, %arg3: memref<4x2xf32, #tpu.memory_space<vmem>>, %arg4: memref<1x4x256xf32, #tpu.memory_space<vmem>>) attributes {dimension_semantics = [#tpu.dimension_semantics<parallel>, #tpu.dimension_semantics<parallel>], iteration_bounds = array<i64: 2, 1>, scalar_prefetch = 0 : i64, scratch_operands = 0 : i64, tpu.core_type = #tpu.core_type<tc>, window_params = [{transform_indices = @transform_0, window_bounds = array<i64: 1, 4, 256>}, {pipeline_mode = #tpu.pipeline_mode<synchronous>, transform_indices = @transform_1, window_bounds = array<i64: 4, 2>}, {transform_indices = @transform_2, window_bounds = array<i64: 1, 4, 256>}]} {
    %c0 = arith.constant 0 : index
    %c0_0 = arith.constant 0 : index
    %c0_1 = arith.constant 0 : index
    %0 = vector.load %arg2[%c0, %c0_0, %c0_1] : memref<1x4x256xf32, #tpu.memory_space<vmem>>, vector<1x4x256xf32>
    %cst = arith.constant dense<0.000000e+00> : vector<1x256xf32>
    %1 = vector.multi_reduction <add>, %0, %cst [1] : vector<1x4x256xf32> to vector<1x256xf32>
    %2 = vector.shape_cast %1 : vector<1x256xf32> to vector<1x1x256xf32>
    %cst_2 = arith.constant 4.000000e+00 : f32
    %3 = vector.broadcast %cst_2 : f32 to vector<1x1x256xf32>
    %4 = arith.divf %2, %3 : vector<1x1x256xf32>
    %5 = vector.broadcast %4 : vector<1x1x256xf32> to vector<1x4x256xf32>
    %6 = arith.subf %0, %5 : vector<1x4x256xf32>
    %7 = arith.mulf %6, %6 : vector<1x4x256xf32>
    %cst_3 = arith.constant dense<0.000000e+00> : vector<1x256xf32>
    %8 = vector.multi_reduction <add>, %7, %cst_3 [1] : vector<1x4x256xf32> to vector<1x256xf32>
    %9 = vector.shape_cast %8 : vector<1x256xf32> to vector<1x1x256xf32>
    %cst_4 = arith.constant 4.000000e+00 : f32
    %10 = vector.broadcast %cst_4 : f32 to vector<1x1x256xf32>
    %11 = arith.divf %9, %10 : vector<1x1x256xf32>
    %cst_5 = arith.constant 9.99999997E-7 : f32
    %12 = vector.broadcast %cst_5 : f32 to vector<1x1x256xf32>
    %13 = arith.addf %11, %12 : vector<1x1x256xf32>
    %14 = math.rsqrt %13 : vector<1x1x256xf32>
    %15 = vector.broadcast %14 : vector<1x1x256xf32> to vector<1x4x256xf32>
    %16 = arith.mulf %6, %15 : vector<1x4x256xf32>
    %c0_6 = arith.constant 0 : index
    %c0_7 = arith.constant 0 : index
    %17 = vector.load %arg3[%c0_6, %c0_7] : memref<4x2xf32, #tpu.memory_space<vmem>>, vector<4x1xf32>
    %18 = vector.shape_cast %17 : vector<4x1xf32> to vector<1x4x1xf32>
    %c0_8 = arith.constant 0 : index
    %c1 = arith.constant 1 : index
    %19 = vector.load %arg3[%c0_8, %c1] : memref<4x2xf32, #tpu.memory_space<vmem>>, vector<4x1xf32>
    %20 = vector.shape_cast %19 : vector<4x1xf32> to vector<1x4x1xf32>
    %21 = vector.broadcast %18 : vector<1x4x1xf32> to vector<1x4x256xf32>
    %22 = arith.mulf %16, %21 : vector<1x4x256xf32>
    %23 = vector.broadcast %20 : vector<1x4x1xf32> to vector<1x4x256xf32>
    %24 = arith.addf %22, %23 : vector<1x4x256xf32>
    %c0_9 = arith.constant 0 : index
    %c0_10 = arith.constant 0 : index
    %c0_11 = arith.constant 0 : index
    %25 = vector.load %arg4[%c0_9, %c0_10, %c0_11] : memref<1x4x256xf32, #tpu.memory_space<vmem>>, vector<1x4x256xf32>
    tpu.vector_store %arg4[%c0_9, %c0_10, %c0_11], %24 {strides = array<i32>} : memref<1x4x256xf32, #tpu.memory_space<vmem>>, vector<1x4x256xf32>,
    return
  }
  func.func @transform_0(%arg0: i32, %arg1: i32) -> (i32, i32, i32) {
    %c0_i32 = arith.constant 0 : i32
    %c0_i32_0 = arith.constant 0 : i32
    return %arg0, %c0_i32, %arg1 : i32, i32, i32
  }
  func.func @transform_1(%arg0: i32, %arg1: i32) -> (i32, i32) {
    %c0_i32 = arith.constant 0 : i32
    %c0_i32_0 = arith.constant 0 : i32
    %c0_i32_1 = arith.constant 0 : i32
    return %c0_i32, %c0_i32_0 : i32, i32
  }
  func.func @transform_2(%arg0: i32, %arg1: i32) -> (i32, i32, i32) {
    %c0_i32 = arith.constant 0 : i32
    %c0_i32_0 = arith.constant 0 : i32
    return %arg0, %c0_i32, %arg1 : i32, i32, i32
  }
}

</mosaic_0001>

<bundles_post_ra>
// kernel: tpu_custom_call.1
= control target key start
LH: loop header
LB: loop body
LE: loop exit
PB: predicated region body
PF: predicated region fallthrough
CT: control target
= control target key end

     0   :  { %7 = vsyncpa [#allocation3], 0  ;;  %s728_s0 = inlined_call_operand.hbm [shape: f32[2,4,256], index: 0, kind: input, shape index: {}]   ;;  %s729_s1 = inlined_call_operand.vmem [shape: f32[4,2], index: 1, kind: input, shape index: {}]   ;;  %s730_s2 = inlined_call_operand.hbm [shape: f32[2,4,256], index: 2, kind: output, shape index: {}]  }
   0x1   :  { %9 = vsyncpa [#allocation3 + $0x1], 0 }
   0x2   :  { %10 = vsyncpa [#allocation4], 0 }
   0x3   :  { %12 = vsyncpa [#allocation4 + $0x1], 0  ;;  %s583_s9 = smov 0   ;;  %s585_s10 = smov 0  }
   0x4   :  { %s587_s11 = smov 0   ;;  %s589_s12 = smov 0  }
   0x5   :  { %s591_s13 = smov 0   ;;  %s593_s14 = smov 0  }
   0x6 LB: > { %s364_s15 = sadd.s32 4294967295, %s561_s14   ;;  %s365_s16 = sadd.s32 4294967294, %s561_s14   ;;  %s561_s14 = sphi %s593_s14, %s18_s14   ;;  %s557_s13 = sphi %s591_s13, %s742_s13   ;;  %s553_s12 = sphi %s589_s12, %s741_s12   ;;  %s549_s11 = sphi %s587_s11, %s740_s11   ;;  %s545_s10 = sphi %s585_s10, %s739_s10   ;;  %s541_s9 = sphi %s583_s9, %s738_s9  }
   0x7   : > { %s30_s17 = sadd.s32 1, %s557_s13  ;;  %s39_s18 = sadd.s32 1, %s549_s11 }
   0x8   : > { %p32_p0 = scmp.ge.s32.totalorder %s30_s17, 2  ;;  %p46_p1 = scmp.ne.s32.totalorder %s549_s11, %s545_s10 }
   0x9   : > { %p47_p2 = scmp.eq.s32.totalorder %s561_s14, 0  ;;  %p52_p3 = scmp.ne.s32.totalorder %s545_s10, %s541_s9 }
   0xa   : > { %s744_s17 = smov (%p32_p0, %s30_s17), 0  ;;  %p53_p5 = scmp.eq.s32.totalorder %s364_s15, 0 }
   0xb   : > { %p624_p4 = por %p47_p2, %p46_p1  ;;  %s34_s20 = ssub.s32 %s557_s13, %s744_s17 }
   0xc   : > { %p99_p6 = scmp.eq.s32.totalorder %s364_s15, 1  ;;  %p37_p7 = scmp.eq.s32.totalorder %s34_s20, 0 }
   0xd   : > { %p630_p8 = por %p53_p5, %p52_p3  ;;  %p105_p10 = scmp.eq.s32.totalorder %s365_s16, 1 }
   0xe   : > { %p634_p9 = por %p99_p6, %p46_p1  ;;  %p393_p13 = scmp.lt.s32.totalorder %s561_s14, 2 }
   0xf   : > { %s639_s23 = scalar_select %p37_p7, %s549_s11, %s39_s18  }
  0x10   : > { %p641_p11 = por %p105_p10, %p52_p3  ;;  %s128_s25 = sand.u32 1, %s549_s11  }
  0x11   : > { %s368_s26 = sshll.u32 %s128_s25, 3  ;;  %s379_s27 = sshll.u32 %s557_s13, 7 }
  0x12   : > { %s734_s24 = scalar_select %p641_p11, 1, 0 }
  0x13   : > { %s140_s30 = scalar_lea.hbm %s728_s0, %s379_s27  ;;  %s132_s3 = scalar_lea.vmem [#allocation2], %s368_s26 }
  0x14   : > { %s142_s4 = sshll.u32 %s132_s3, 4  ;;  %p654_p0 = pnand %p393_p13, %p624_p4  ;;  %s143_s4 = int_to_ptr.vmem [resolvable:$true] %s142_s4 }
  0x15   : > { %p371_p1 = scmp.ge.s32.totalorder %s561_s14, 1  ;;  %p147_p2 = scmp.lt.s32.totalorder %s561_s14, 3 }
  0x16   : > { %s129_s6 = scalar_lea.sflag [#allocation3], %s128_s25  ;;  %p455_p3 = pneg %p654_p0 }
  0x17   : > { %s466_s7 = scalar_lea.vmem %s143_s4, 128  ;;  %s563_s8 = smov [#allocation2]  }
  0x18   : > { %p467_p5 = scmp.ne.s32.totalorder %s143_s4, %s466_s7  ;;  %s471_s15 = sshll.u32 %s563_s8, 4  ;;  %s472_s15 = int_to_ptr.vmem [resolvable:$false] %s471_s15 }
  0x19   : > { %s473_s16 = scalar_lea.vmem %s472_s15, 256  ;;  %p474_p10 = scmp.lt.s32.totalorder %s143_s4, %s472_s15 }
  0x1a   : > { %p469_p6 = pnand %p467_p5, %p455_p3  ;;  %p475_p12 = scmp.lt.s32.totalorder %s473_s16, %s466_s7 }
  0x1c   : > { %p470_p7 = pneg %p469_p6  ;;  %p476_p4 = por %p475_p12, %p474_p10 }
  0x1e   : > { %p477_p13 = pnand %p476_p4, %p470_p7 }
  0x20   : > { %480 = shalt.err (!%p477_p13)
}
  0x21   : > { %388 = dma.hbm_to_vmem [thread:$0]  (!%p654_p0), %s140_s30, 128, %s143_s4, %s129_s6  }
  0x22   : > { %p148_p11 = pnand %p371_p1, %p147_p2 }
  0x23   : > { %s669_s18 = sand.u32 (!%p148_p11), 1, %s545_s10  }
  0x24   : > { %151 = sbr.rel (%p148_p11) target bundleno = 190 (0xbe), region = 28  ;;  %s372_s19 = sshll.u32 (!%p148_p11), %s669_s18, 3 }
  0x25   : > { %s154_s20 = scalar_lea.sflag (!%p148_p11), [#allocation3], %s669_s18  ;;  %s157_s25 = scalar_lea.vmem (!%p148_p11), [#allocation2], %s372_s19 }
  0x29   : > { %532 = dma.done.wait (%p630_p8), %s154_s20, 128  }
  0x2a   : > { %534 = vsyncadd (%p630_p8), %s154_s20, 4294967168  ;;  %v564_v0 = vmov 0   ;;  %v236_v1 = vld [vmem:[%s729_s1] sm:$0xf]  ;;  %v565_v2 = vmov 1   ;;  %vm184_vm0 = vcmask 1043456   ;;  %v244_v45 = vlaneseq }
  0x2b   : > { %446 = vset.pattern.permute.xlu0 %v564_v0  ;;  %v180_v3 = vld [vmem:[%s157_s25] sm:$0xff]  ;;  %v566_v43 = vmov 839922192   ;;  %s380_s21 = sshll.u32 %s553_s12, 7  ;;  %s177_s28 = scalar_lea.vmem [#allocation5], %s372_s19 }
  0x2c   : > { %239 = vperm.xlu0 %446, %v236_v1   ;;  %v182_v4 = vcombine.high %v180_v3, %v180_v3  ;;  %v185_v5 = vsel %vm184_vm0, %v180_v3, 0.0  ;;  %v242_v44 = vunpack.c.l.s4 %v566_v43  ;;  %v245_v48 = vshrl.u32 %v244_v45, 7  ;;  %s280_s29 = sshll.u32 %s177_s28, 4  ;;  %s278_s4 = scalar_lea.hbm %s730_s2, %s380_s21  ;;  %s281_s29 = int_to_ptr.vmem [resolvable:$true] %s280_s29 }
  0x2d   : > { %v186_v7 = vrot.slane %v185_v5, 4  ;;  %s264_s5 = scalar_lea.sflag [#allocation4], %s669_s18  ;;  %s481_s6 = scalar_lea.vmem %s281_s29, 128 }
  0x2e   : > { %v192_v6 = vsel %vm184_vm0, %v182_v4, 0.0  ;;  %v243_v47 = vunpack.c.0.s8 %v242_v44  ;;  %p482_p8 = scmp.ne.s32.totalorder %s281_s29, %s481_s6  ;;  %s567_s7 = smov [#allocation5]  }
  0x2f   : > { %v193_v8 = vrot.slane %v192_v6, 4  ;;  %v187_v9 = vadd.f32 %v186_v7, %v185_v5  ;;  %s485_s12 = sshll.u32 %s567_s7, 4  ;;  %s486_s12 = int_to_ptr.vmem [resolvable:$false] %s485_s12 }
  0x30   : > { %447 = vset.pattern.permute.xlu0 %v565_v2  ;;  %v246_v50 = vsub.s32 %v243_v47, %v245_v48  ;;  %p483_p11 = pnand %p482_p8, %p634_p9  ;;  %s487_s8 = scalar_lea.vmem %s486_s12, 256 }
  0x31   : > { %251 = vperm.xlu0 %447, %v236_v1   ;;  %v194_v10 = vadd.f32 %v193_v8, %v192_v6  ;;  %v188_v11 = vrot.slane %v187_v9, 2  ;;  %p488_p0 = scmp.lt.s32.totalorder %s281_s29, %s486_s12  ;;  %p489_p1 = scmp.lt.s32.totalorder %s487_s8, %s481_s6 }
  0x32   : > { %p484_p12 = pneg %p483_p11 }
  0x33   : > { %v195_v12 = vrot.slane %v194_v10, 2  ;;  %v189_v13 = vadd.f32 %v188_v11, %v187_v9  ;;  %p490_p2 = por %p489_p1, %p488_p0 }
  0x35   : > { %v196_v14 = vadd.f32 %v195_v12, %v194_v10  ;;  %v190_v15 = vrot.slane %v189_v13, 1  ;;  %p491_p3 = pnand %p490_p2, %p484_p12 }
  0x37   : > { %v197_v16 = vrot.slane %v196_v14, 1  ;;  %v191_v17 = vadd.f32 %v190_v15, %v189_v13 }
  0x39   : > { %v198_v18 = vadd.f32 %v197_v16, %v196_v14  ;;  %v200_v19 = vmul.f32 0.25, %v191_v17 }
  0x3b   : > { %v201_v20 = vmul.f32 0.25, %v198_v18 }
  0x3d   : > { %v204_v21 = vcombine.low %v200_v19, %v201_v20 }
  0x3f   : > { %v206_v22 = vsub.f32 %v180_v3, %v204_v21 }
  0x41   : > { %v207_v23 = vmul.f32 %v206_v22, %v206_v22 }
  0x43   : > { %v209_v24 = vcombine.high %v207_v23, %v207_v23  ;;  %v211_v25 = vsel %vm184_vm0, %v207_v23, 0.0 }
  0x44   : > { %v212_v27 = vrot.slane %v211_v25, 4 }
  0x45   : > { %v218_v26 = vsel %vm184_vm0, %v209_v24, 0.0 }
  0x46   : > { %v219_v28 = vrot.slane %v218_v26, 4  ;;  %v213_v29 = vadd.f32 %v212_v27, %v211_v25 }
  0x48   : > { %v220_v30 = vadd.f32 %v219_v28, %v218_v26  ;;  %v214_v31 = vrot.slane %v213_v29, 2 }
  0x4a   : > { %v221_v32 = vrot.slane %v220_v30, 2  ;;  %v215_v33 = vadd.f32 %v214_v31, %v213_v29 }
  0x4c   : > { %v222_v34 = vadd.f32 %v221_v32, %v220_v30  ;;  %v216_v35 = vrot.slane %v215_v33, 1 }
  0x4e   : > { %v223_v36 = vrot.slane %v222_v34, 1  ;;  %v217_v37 = vadd.f32 %v216_v35, %v215_v33 }
  0x50   : > { %v224_v38 = vadd.f32 %v223_v36, %v222_v34  ;;  %v225_v39 = vmul.f32 0.25, %v217_v37 }
  0x52   : > { %v226_v40 = vmul.f32 0.25, %v224_v38  ;;  %v227_v41 = vadd.f32 1e-06, %v225_v39 }
  0x54   : > { %v228_v42 = vadd.f32 1e-06, %v226_v40  ;;  %449 = vrsqrt.f32 %v227_v41 }
  0x56   : > { %451 = vrsqrt.f32 %v228_v42 }
  0x61   : > { %v450_v46 = vpop.eup %449 }
  0x63   : > { %v452_v49 = vpop.eup %451 }
  0x64   : > { %v233_v51 = vcombine.low %v450_v46, %v452_v49 }
  0x66   : > { %v235_v53 = vmul.f32 %v233_v51, %v206_v22 }
  0xa7   : > { %v240_v52 = vpop.permute.xlu0 %239 }
  0xa8   : > { %v247_v54 = vrot.slane %v240_v52, %v246_v50 }
  0xaa   : > { %v249_v56 = vmul.f32 %v247_v54, %v235_v53 }
  0xac   : > { %v252_v55 = vpop.permute.xlu0 %251 }
  0xad   : > { %v259_v57 = vrot.slane %v252_v55, %v246_v50 }
  0xaf   : > { %v261_v58 = vadd.f32 %v259_v57, %v249_v56 }
  0xb1   : > { %262 = vst [vmem:[%s177_s28] sm:$0xff] %v261_v58 }
  0xb2   : > { %494 = shalt.err (!%p491_p3)
}
  0xb3   : > { %s495_s15 = scalar_lea.hbm %s278_s4, 128  ;;  %s499_s19 = scalar_lea.hbm %s730_s2, 256 }
  0xb4   : > { %p496_p5 = scmp.ne.s32.totalorder %s278_s4, %s495_s15  ;;  %p500_p10 = scmp.lt.s32.totalorder %s278_s4, %s730_s2 }
  0xb5   : > { %p501_p4 = scmp.lt.s32.totalorder %s499_s19, %s495_s15 }
  0xb6   : > { %p497_p6 = pnand %p496_p5, %p634_p9 }
  0xb7   : > { %p502_p13 = por %p501_p4, %p500_p10 }
  0xb8   : > { %p498_p7 = pneg %p497_p6 }
  0xba   : > { %p503_p8 = pnand %p502_p13, %p498_p7 }
  0xbc   : > { %506 = shalt.err (!%p503_p8)
}
  0xbd   : > { %383 = dma.vmem_to_hbm [thread:$0]  (%p634_p9), %s281_s29, 128, %s278_s4, %s264_s5  }
  0xbe PF: > { %s292_s26 = sand.u32 1, %s541_s9   ;;  %p736_p11 = scmp.ne.s32.totalorder %s734_s24, 0 }
  0xbf   : > { %p737_p12 = scmp.ge.s32.totalorder %s561_s14, 2  ;;  %s293_s27 = scalar_lea.sflag [#allocation4], %s292_s26 }
  0xc1   : > { %p390_p0 = pnand %p737_p12, %p736_p11 }
  0xc3   : > { %p391_p1 = pneg %p390_p0 }
  0xc5   : > { %536 = dma.done.wait (%p391_p1), %s293_s27, 128  }
  0xc6   : > { %538 = vsyncadd (%p391_p1), %s293_s27, 4294967168  ;;  %s18_s14 = sadd.s32 1, %s561_s14   ;;  %s738_s9 = smov %s545_s10 }
  0xc7   : > { %p15_p2 = scmp.ge.s32.totalorder %s18_s14, 4   ;;  %s739_s10 = smov %s549_s11 }
  0xc8   : > { %s740_s11 = smov %s639_s23  ;;  %s741_s12 = smov %s557_s13 }
  0xc9   : > { %s742_s13 = smov %s744_s17  ;;  %17 = sbr.rel (!%p15_p2) target bundleno = 6 (0x6), region = 73 }
  0xce   :  { %298 = vsyncpa [#allocation3], 1 }
  0xcf   :  { %300 = vsyncpa [#allocation3 + $0x1], 1 }
  0xd0   :  { %301 = vsyncpa [#allocation4], 1 }
  0xd1   :  { %303 = vsyncpa [#allocation4 + $0x1], 1 }

</bundles_post_ra>
